<compile_context>
chip_gen: v7x
topology: tpu7x:2x2x1
jax: 0.10.0
libtpu: 0.0.40
codegen_flags: <defaults>
</compile_context>

<pallas_src>
import jax
import jax.numpy as jnp
from jax import lax
from jax.experimental import pallas as pl
from jax.experimental.pallas import tpu as pltpu


def _round_up(x, m):
    return ((x + m - 1) // m) * m


def _cdiv(a, b):
    return -(-a // b)


def _vmem_capacity_bytes():
    try:
        return int(pltpu.get_tpu_info().vmem_capacity_bytes)
    except Exception:
        return 64 * 1024 * 1024  # conservative (v7x-sized) fallback


def _choose_tile_rows(n, c, itemsize, vmem_cap_bytes):
    # Per-grid-step working set ≈ double-buffered native-dtype input tile plus
    # ~3 f32-sized temporaries (f32 upcast, exp(x-m), masked target logits):
    #   bytes_per_row ≈ C * (2*itemsize + 3*4)
    bytes_per_row = max(1, c * (2 * itemsize + 3 * 4))
    if vmem_cap_bytes >= 96 * 1024 * 1024:
        budget = 48 * 1024 * 1024   # v5e / v6e: 128 MiB physical VMEM
    else:
        budget = 30 * 1024 * 1024   # v7x: 64 MiB physical VMEM
    rows = max(8, budget // bytes_per_row)
    rows = (rows // 8) * 8
    # never allocate a block taller than the (8-rounded) batch
    rows = min(rows, _round_up(n, 8))
    # keep >= 2 grid steps when possible so a "parallel" grid axis can feed
    # both TensorCores on v7x (near-free on single-TC parts)
    if n >= 16 and rows >= _round_up(n, 8):
        rows = max(8, _round_up(_cdiv(n, 2), 8))
    return rows


def _make_focal_kernel(gamma, true_n):
    gamma_f = float(gamma)

    def focal_kernel(logits_ref, targets_ref, alpha_t_ref, out_ref):
        pid = pl.program_id(0)

        x = logits_ref[...].astype(jnp.float32)        # (T, C) f32 compute
        tgt = targets_ref[...]                         # (T, 1) int32
        alpha_t = alpha_t_ref[...]                     # (T, 1) f32 (pre-gathered)
        t_rows, n_cls = x.shape

        # class-selection predicate (scatter_(1, ids, 1.) equivalent), no f32
        # one-hot materialized
        col = lax.broadcasted_iota(jnp.int32, (t_rows, n_cls), 1)
        pred = col == tgt                              # (T, C) bool

        # log-sum-exp over classes: log_p = logit_target - (m + log(sum exp(x-m)))
        m = jnp.max(x, axis=1, keepdims=True)                         # (T, 1)
        lse = m + jnp.log(jnp.sum(jnp.exp(x - m), axis=1, keepdims=True))
        logit_t = jnp.sum(jnp.where(pred, x, 0.0), axis=1, keepdims=True)
        log_p = jnp.minimum(logit_t - lse, 0.0)                       # (T, 1)
        probs = jnp.exp(log_p)                                        # (T, 1)

        one_minus = 1.0 - probs
        if gamma_f.is_integer():
            focal_w = lax.integer_pow(one_minus, int(gamma_f))        # exact torch.pow
        else:
            focal_w = jnp.power(one_minus, jnp.float32(gamma_f))
        per_row = -alpha_t * focal_w * log_p                          # (T, 1)

        # drop rows past the true batch size with a SELECT (robust to NaN/Inf
        # garbage in the out-of-bounds part of the last, partial block)
        row = lax.broadcasted_iota(jnp.int32, (t_rows, 1), 0) + pid * t_rows
        per_row = jnp.where(row < true_n, per_row, 0.0)
        partial = jnp.sum(per_row)

        # broadcast the scalar partial over this step's (8, 128) output block;
        # the wrapper reads element [8*i, 0] of each tile block.
        out_ref[...] = jnp.full((8, 128), partial, dtype=jnp.float32)

    return focal_kernel


def focal_loss(logits, targets, alpha, gamma=2, size_average=True):
    """logits: (N, C) f32/bf16; targets: (N,) int; alpha: (C,) or (C,1) f32.

    Returns a scalar f32, matching FocalLoss.forward (size_average -> mean).
    """
    n, c = logits.shape
    vmem_cap = _vmem_capacity_bytes()
    tile_rows = _choose_tile_rows(n, c, jnp.dtype(logits.dtype).itemsize, vmem_cap)
    g = _cdiv(n, tile_rows)

    targets2d = targets.reshape(n, 1).astype(jnp.int32)
    alpha_f = jnp.asarray(alpha, jnp.float32).reshape(-1)
    alpha_t2d = alpha_f[targets2d[:, 0]].reshape(n, 1)   # alpha[targets], gathered once

    vmem_limit = (64 * 1024 * 1024 if vmem_cap >= 96 * 1024 * 1024
                  else 40 * 1024 * 1024)

    partials = pl.pallas_call(
        _make_focal_kernel(gamma, n),
        out_shape=jax.ShapeDtypeStruct((g * 8, 128), jnp.float32),
        grid=(g,),
        in_specs=[
            pl.BlockSpec((tile_rows, c), lambda i: (i, 0)),   # logits tile
            pl.BlockSpec((tile_rows, 1), lambda i: (i, 0)),   # targets tile
            pl.BlockSpec((tile_rows, 1), lambda i: (i, 0)),   # per-row alpha tile
        ],
        out_specs=pl.BlockSpec((8, 128), lambda i: (i, 0)),   # per-tile partial block
        compiler_params=pltpu.CompilerParams(
            dimension_semantics=("parallel",),
            vmem_limit_bytes=vmem_limit,
        ),
    )(logits, targets2d, alpha_t2d)

    total = jnp.sum(partials[0::8, 0])   # one partial per grid step
    if size_average:
        return total / jnp.float32(n)
    return total


if __name__ == "__main__":
    key = jax.random.PRNGKey(0)
    N, C = 8, 4  # batch of 8 samples, 4 classes

    k_logits, k_targets = jax.random.split(key)
    logits = jax.random.normal(k_logits, (N, C), dtype=jnp.float32)
    targets = jax.random.randint(k_targets, (N,), 0, C, dtype=jnp.int32)

    # FocalLoss.__init__ with alpha=None -> alpha = ones(class_num, 1)
    alpha = jnp.ones((C,), dtype=jnp.float32)

    loss = focal_loss(logits, targets, alpha, gamma=2, size_average=True)
    jax.block_until_ready(loss)

    # pure-JAX reference (same math as the torch module)
    def ref_loss(lg, tg, al, gamma=2.0, size_average=True):
        p = jax.nn.softmax(lg, axis=1)
        mk = jax.nn.one_hot(tg, lg.shape[1], dtype=jnp.float32)
        pr = jnp.maximum(jnp.sum(p * mk, axis=1), 1e-32)
        bl = -al[tg] * (1.0 - pr) ** gamma * jnp.log(pr)
        return jnp.mean(bl) if size_average else jnp.sum(bl)

    ref = ref_loss(logits, targets, alpha)
    assert jnp.allclose(loss, ref, rtol=1e-5, atol=1e-6), (loss, ref)

    # ragged batch (exercises the partial last block + select masking) + sum
    N2 = 13
    k3, k4 = jax.random.split(k_logits)
    logits2 = jax.random.normal(k3, (N2, C), dtype=jnp.float32)
    targets2 = jax.random.randint(k4, (N2,), 0, C, dtype=jnp.int32)
    loss2 = focal_loss(logits2, targets2, alpha, gamma=2, size_average=False)
    jax.block_until_ready(loss2)
    ref2 = ref_loss(logits2, targets2, alpha, size_average=False)
    assert jnp.allclose(loss2, ref2, rtol=1e-5, atol=1e-6), (loss2, ref2)

    # larger batch to exercise a multi-step ("parallel") grid
    N3 = 40
    k5, k6 = jax.random.split(k_targets)
    logits3 = jax.random.normal(k5, (N3, C), dtype=jnp.float32)
    targets3 = jax.random.randint(k6, (N3,), 0, C, dtype=jnp.int32)
    loss3 = focal_loss(logits3, targets3, alpha, gamma=2, size_average=True)
    jax.block_until_ready(loss3)
    ref3 = ref_loss(logits3, targets3, alpha, size_average=True)
    assert jnp.allclose(loss3, ref3, rtol=1e-5, atol=1e-6), (loss3, ref3)

    print("KERNEL_OK")
</pallas_src>

<mosaic_0001>
module attributes {stable_mosaic.version = 11 : i64} {
  func.func @focal_kernel(%arg0: i32, %arg1: memref<8x4xf32, #tpu.memory_space<vmem>>, %arg2: memref<8x1xi32, #tpu.memory_space<vmem>>, %arg3: memref<8x1xf32, #tpu.memory_space<vmem>>, %arg4: memref<8x128xf32, #tpu.memory_space<vmem>>) attributes {dimension_semantics = [#tpu.dimension_semantics<parallel>], iteration_bounds = array<i64: 1>, scalar_prefetch = 0 : i64, scratch_operands = 0 : i64, tpu.core_type = #tpu.core_type<tc>, window_params = [{transform_indices = @transform_0, window_bounds = array<i64: 8, 4>}, {transform_indices = @transform_1, window_bounds = array<i64: 8, 1>}, {transform_indices = @transform_2, window_bounds = array<i64: 8, 1>}, {transform_indices = @transform_3, window_bounds = array<i64: 8, 128>}]} {
    %c0 = arith.constant 0 : index
    %c0_0 = arith.constant 0 : index
    %0 = vector.load %arg1[%c0, %c0_0] : memref<8x4xf32, #tpu.memory_space<vmem>>, vector<8x4xf32>
    %c0_1 = arith.constant 0 : index
    %c0_2 = arith.constant 0 : index
    %1 = vector.load %arg2[%c0_1, %c0_2] : memref<8x1xi32, #tpu.memory_space<vmem>>, vector<8x1xi32>
    %c0_3 = arith.constant 0 : index
    %c0_4 = arith.constant 0 : index
    %2 = vector.load %arg3[%c0_3, %c0_4] : memref<8x1xf32, #tpu.memory_space<vmem>>, vector<8x1xf32>
    %3 = tpu.iota {dimensions = array<i32: 1>} : vector<8x4xi32>
    %4 = vector.broadcast %1 : vector<8x1xi32> to vector<8x4xi32>
    %5 = arith.cmpi eq, %3, %4 : vector<8x4xi32>
    %cst = arith.constant dense<0xFF800000> : vector<8xf32>
    %6 = vector.multi_reduction <maximumf>, %0, %cst [1] : vector<8x4xf32> to vector<8xf32>
    %7 = vector.shape_cast %6 : vector<8xf32> to vector<8x1xf32>
    %8 = vector.broadcast %7 : vector<8x1xf32> to vector<8x4xf32>
    %9 = arith.subf %0, %8 : vector<8x4xf32>
    %10 = math.exp %9 : vector<8x4xf32>
    %cst_5 = arith.constant dense<0.000000e+00> : vector<8xf32>
    %11 = vector.multi_reduction <add>, %10, %cst_5 [1] : vector<8x4xf32> to vector<8xf32>
    %12 = vector.shape_cast %11 : vector<8xf32> to vector<8x1xf32>
    %13 = math.log %12 : vector<8x1xf32>
    %14 = arith.addf %7, %13 : vector<8x1xf32>
    %cst_6 = arith.constant 0.000000e+00 : f32
    %15 = vector.broadcast %cst_6 : f32 to vector<8x4xf32>
    %16 = arith.select %5, %0, %15 : vector<8x4xi1>, vector<8x4xf32>
    %cst_7 = arith.constant dense<0.000000e+00> : vector<8xf32>
    %17 = vector.multi_reduction <add>, %16, %cst_7 [1] : vector<8x4xf32> to vector<8xf32>
    %18 = vector.shape_cast %17 : vector<8xf32> to vector<8x1xf32>
    %19 = arith.subf %18, %14 : vector<8x1xf32>
    %cst_8 = arith.constant 0.000000e+00 : f32
    %20 = vector.broadcast %cst_8 : f32 to vector<8x1xf32>
    %21 = arith.minimumf %19, %20 : vector<8x1xf32>
    %22 = math.exp %21 : vector<8x1xf32>
    %cst_9 = arith.constant 1.000000e+00 : f32
    %23 = vector.broadcast %cst_9 : f32 to vector<8x1xf32>
    %24 = arith.subf %23, %22 : vector<8x1xf32>
    %25 = arith.mulf %24, %24 : vector<8x1xf32>
    %cst_10 = arith.constant 0.000000e+00 : f32
    %26 = vector.broadcast %cst_10 : f32 to vector<8x1xf32>
    %27 = arith.subf %26, %2 : vector<8x1xf32>
    %28 = arith.mulf %27, %25 : vector<8x1xf32>
    %29 = arith.mulf %28, %21 : vector<8x1xf32>
    %30 = tpu.iota {dimensions = array<i32: 0>} : vector<8x1xi32>
    %c8_i32 = arith.constant 8 : i32
    %31 = arith.muli %arg0, %c8_i32 : i32
    %32 = vector.broadcast %31 : i32 to vector<8x1xi32>
    %33 = arith.addi %30, %32 : vector<8x1xi32>
    %c8_i32_11 = arith.constant 8 : i32
    %34 = vector.broadcast %c8_i32_11 : i32 to vector<8x1xi32>
    %35 = arith.cmpi slt, %33, %34 : vector<8x1xi32>
    %cst_12 = arith.constant 0.000000e+00 : f32
    %36 = vector.broadcast %cst_12 : f32 to vector<8x1xf32>
    %37 = arith.select %35, %29, %36 : vector<8x1xi1>, vector<8x1xf32>
    %38 = vector.shape_cast %37 : vector<8x1xf32> to vector<1x8x1xf32>
    %cst_13 = arith.constant dense<0.000000e+00> : vector<1xf32>
    %39 = vector.multi_reduction <add>, %38, %cst_13 [1, 2] : vector<1x8x1xf32> to vector<1xf32>
    %40 = vector.shape_cast %39 : vector<1xf32> to vector<1x1x1xf32>
    %41 = vector.extract %40[0, 0, 0] : f32 from vector<1x1x1xf32>
    %42 = vector.broadcast %41 : f32 to vector<8x128xf32>
    %c0_14 = arith.constant 0 : index
    %c0_15 = arith.constant 0 : index
    %43 = vector.load %arg4[%c0_14, %c0_15] : memref<8x128xf32, #tpu.memory_space<vmem>>, vector<8x128xf32>
    tpu.vector_store %arg4[%c0_14, %c0_15], %42 {strides = array<i32>} : memref<8x128xf32, #tpu.memory_space<vmem>>, vector<8x128xf32>,
    return
  }
  func.func @transform_0(%arg0: i32) -> (i32, i32) {
    %c0_i32 = arith.constant 0 : i32
    %c0_i32_0 = arith.constant 0 : i32
    return %arg0, %c0_i32 : i32, i32
  }
  func.func @transform_1(%arg0: i32) -> (i32, i32) {
    %c0_i32 = arith.constant 0 : i32
    %c0_i32_0 = arith.constant 0 : i32
    return %arg0, %c0_i32 : i32, i32
  }
  func.func @transform_2(%arg0: i32) -> (i32, i32) {
    %c0_i32 = arith.constant 0 : i32
    %c0_i32_0 = arith.constant 0 : i32
    return %arg0, %c0_i32 : i32, i32
  }
  func.func @transform_3(%arg0: i32) -> (i32, i32) {
    %c0_i32 = arith.constant 0 : i32
    %c0_i32_0 = arith.constant 0 : i32
    return %arg0, %c0_i32 : i32, i32
  }
}

</mosaic_0001>

<bundles_post_ra>
// kernel: tpu_custom_call.1
= control target key start
LH: loop header
LB: loop body
LE: loop exit
PB: predicated region body
PF: predicated region fallthrough
CT: control target
= control target key end

     0   :  { %vm24_vm0 = vcmask 31744   ;;  %s165_s0 = inlined_call_operand.vmem [shape: f32[8,4], index: 0, kind: input, shape index: {}]   ;;  %s166_s1 = inlined_call_operand.vmem [shape: s32[8,1], index: 1, kind: input, shape index: {}]   ;;  %s167_s2 = inlined_call_operand.vmem [shape: f32[8,1], index: 2, kind: input, shape index: {}]   ;;  %s168_s3 = inlined_call_operand.hbm [shape: f32[8,128], index: 3, kind: output, shape index: {}]  }
   0x1   :  { %v15_v0 = vld [vmem:[%s165_s0] sm:$0xff] }
   0x2   :  { %8 = vsyncpa [#allocation3], 0  ;;  %v25_v1 = vsel %vm24_vm0, %v15_v0, -inf  ;;  %v119_v2 = vmov 0   ;;  %v16_v3 = vld [vmem:[%s166_s1] sm:$0xff]  ;;  %v18_v7 = vlaneseq  ;;  %vm57_vm2 = vcmask 7168  }
   0x3   :  { %88 = vset.pattern.permute.xlu0 %v119_v2  ;;  %v17_v22 = vld [vmem:[%s167_s2] sm:$0xff]  ;;  %s120_s16 = smov [#allocation2]  }
   0x4   :  { %26 = vmax.xlane.f32.xlu0 %v25_v1  ;;  %v19_v8 = vand.u32 127, %v18_v7  ;;  %v47_v25 = vsub.f32 0.0, %v17_v22  ;;  %s76_s17 = sshll.u32 %s120_s16, 4  ;;  %s77_s17 = int_to_ptr.vmem [resolvable:$true] %s76_s17 }
   0x5   :  { %s95_s18 = scalar_lea.vmem %s77_s17, 128  ;;  %p100_p1 = scmp.lt.s32.totalorder %s77_s17, %s77_s17 }
   0x6   :  { %p96_p0 = scmp.ne.s32.totalorder %s77_s17, %s95_s18  ;;  %p101_p2 = scmp.lt.s32.totalorder %s95_s18, %s95_s18 }
   0x8   :  { %p102_p3 = por %p101_p2, %p100_p1 }
   0xa   :  { %p103_p4 = pnand %p102_p3, %p96_p0 }
  0x1a   :  { %21 = vperm.xlu0 %88, %v16_v3  }
  0x91   :  { %v27_v4 = vpop.xlane.xlu0 %26 }
  0x92   :  { %v28_v5 = vsub.f32 %v15_v0, %v27_v4 }
  0x94   :  { %v29_v6 = vmul.f32 1.442695, %v28_v5 }
  0x96   :  { %89 = vpow2.f32 %v29_v6 }
  0x99   :  { %v22_v9 = vpop.permute.xlu0 %21 }
  0x9a   :  { %vm23_vm1 = vcmp.eq.s32.totalorder %v19_v8, %v22_v9 }
  0x9b   :  { %v37_v11 = vsel %vm23_vm1, %v15_v0, 0.0 }
  0x9c   :  { %v38_v13 = vsel %vm24_vm0, %v37_v11, 0.0 }
  0xa0   :  { %v90_v10 = vpop.eup %89 }
  0xa1   :  { %v31_v12 = vsel %vm24_vm0, %v90_v10, 0.0 }
  0xa2   :  { %32 = vadd.xlane.f32.xlu1 %v31_v12 }
  0xa6   :  { %39 = vadd.xlane.f32.xlu1 %v38_v13 }
 0x12f   :  { %v33_v14 = vpop.xlane.xlu1 %32 }
 0x130   :  { %91 = vlog2.f32 %v33_v14 }
 0x133   :  { %v40_v17 = vpop.xlane.xlu1 %39 }
 0x13a   :  { %v92_v15 = vpop.eup %91 }
 0x13b   :  { %v35_v16 = vmul.f32 0.6931472, %v92_v15 }
 0x13d   :  { %v36_v18 = vadd.f32 %v35_v16, %v27_v4 }
 0x13f   :  { %v41_v19 = vsub.f32 %v40_v17, %v36_v18 }
 0x141   :  { %v42_v20 = vmin.f32 %v41_v19, 0.0 }
 0x143   :  { %v43_v21 = vmul.f32 1.442695, %v42_v20 }
 0x145   :  { %93 = vpow2.f32 %v43_v21 }
 0x14f   :  { %v94_v23 = vpop.eup %93 }
 0x150   :  { %v45_v24 = vsub.f32 1.0, %v94_v23 }
 0x152   :  { %v46_v26 = vmul.f32 %v45_v24, %v45_v24 }
 0x154   :  { %v48_v27 = vmul.f32 %v47_v25, %v46_v26 }
 0x156   :  { %v49_v28 = vmul.f32 %v48_v27, %v42_v20 }
 0x158   :  { %v58_v29 = vsel %vm57_vm2, %v49_v28, 0.0 }
 0x159   :  { %59 = vadd.xlane.f32.xlu1 %v58_v29 }
 0x1e6   :  { %v60_v30 = vpop.xlane.xlu1 %59 }
 0x1e7   :  { %v61_v31 = vrot.slane %v60_v30, 4 }
 0x1e9   :  { %v62_v32 = vadd.f32 %v61_v31, %v60_v30 }
 0x1eb   :  { %v63_v33 = vrot.slane %v62_v32, 2 }
 0x1ed   :  { %v64_v34 = vadd.f32 %v63_v33, %v62_v32 }
 0x1ef   :  { %v65_v35 = vrot.slane %v64_v34, 1 }
 0x1f1   :  { %v66_v36 = vadd.f32 %v65_v35, %v64_v34 }
 0x1f3   :  { %84 = vpush %v66_v36 }
 0x224   :  { %s85_s2 = spop %84 }
 0x225   :  { %v68_v37 = vstv %s85_s2 }
 0x226   :  { %69 = vst [vmem:[#allocation2] sm:$0xff] %v68_v37 }
 0x227   :  { %106 = shalt.err (!%p103_p4)
}
 0x228   :  { %s107_s21 = scalar_lea.hbm %s168_s3, 128 }
 0x229   :  { %p108_p5 = scmp.ne.s32.totalorder %s168_s3, %s107_s21  ;;  %p111_p6 = scmp.lt.u32.totalorder %s107_s21, %s168_s3 }
 0x22b   :  { %p113_p7 = pnand %p111_p6, %p108_p5 }
 0x22d   :  { %116 = shalt.err (!%p113_p7)
}
 0x22e   :  { %79 = dma.vmem_to_hbm [thread:$0]  %s77_s17, 128, %s168_s3, [#allocation3]  }
 0x22f   :  { %117 = dma.done.wait [#allocation3], 128  }
 0x230   :  { %118 = vsyncadd [#allocation3], 4294967168 }
 0x231   :  { %83 = vsyncpa [#allocation3], 1 }

</bundles_post_ra>
